<compile_context>
chip_gen: v5e
topology: v5e:2x2
jax: 0.10.0
libtpu: 0.0.40
codegen_flags: <defaults>
</compile_context>

<pallas_src>
import functools

import jax
import jax.numpy as jnp
from jax.experimental import pallas as pl
from jax.experimental.pallas import tpu as pltpu


def _dyn_gcn_kernel(adj_ref, x0_ref, params_ref, bg_ref, out_ref, *,
                    num_layers, hidden):
    H = hidden
    adj = adj_ref[...]                         # (N, N) normalized adjacency
    x = x0_ref[...]                            # (N, H) node features (carried)

    # Lane/sublane-dense output tile; unused region is sliced away outside.
    out_ref[...] = jnp.zeros_like(out_ref)

    for l in range(num_layers):                # static unroll: L is tiny
        # Packed per-layer params: rows [0:H) = W_l^T, [H] = b_l, [H+1] = wg_l.
        w_l = params_ref[l, 0:H, :]            # (H, H)
        b_l = params_ref[l, H:H + 1, :]        # (1, H)
        wg_l = params_ref[l, H + 1:H + 2, :]   # (1, H) lane-dense gate weight

        # GCNConv: A_hat @ (x @ W_l^T) + b_l, then ReLU (MXU, f32).
        xw = jnp.dot(x, w_l, preferred_element_type=jnp.float32)          # (N, H)
        h = jnp.dot(adj, xw, preferred_element_type=jnp.float32) + b_l
        h = jnp.maximum(h, 0.0)

        # GlobalAttention gate on VPU + XLU lane reduce (keeps MXU free for
        # the next layer's matmuls). Bias is an SMEM scalar.
        gate_logit = jnp.sum(h * wg_l, axis=-1, keepdims=True) + bg_ref[l]  # (N, 1)
        gate = jax.nn.sigmoid(gate_logit)      # in (0,1): exp below can't overflow
        e = jnp.exp(gate)                      # unnormalized softmax over nodes
        s = jnp.sum(e, axis=0, keepdims=True)          # (1, 1)
        r = jnp.sum(e * h, axis=0, keepdims=True)      # (1, H)

        # Static-row store: this layer's readout retires immediately.
        out_ref[l:l + 1, 0:H] = r / s

        x = h                                  # carry to next layer


def my_dynamic_gcn_pallas(adj, x, w_t, b, wg, bg):
    """adj: (N,N), x: (N,H), w_t: (L,H,H) pre-transposed GCN weights,
    b: (L,1,H) GCN bias, wg: (L,1,H) gate weights (lane-dense),
    bg: (L,) gate bias scalars. Returns (1, L, H)."""
    N, H = x.shape
    L = w_t.shape[0]

    # Pack all dense per-layer params into one slab -> a single input DMA.
    # (In a real deployment this packing would be done once, ahead of time.)
    params = jnp.concatenate([w_t, b, wg], axis=1)     # (L, H+2, H)

    # Output as a full (8, 128) f32 tile so the store/writeback is lane-dense.
    out_rows = max(8, L)
    out_cols = max(128, H)

    kernel = functools.partial(_dyn_gcn_kernel, num_layers=L, hidden=H)

    out = pl.pallas_call(
        kernel,
        out_shape=jax.ShapeDtypeStruct((out_rows, out_cols), jnp.float32),
        in_specs=[
            pl.BlockSpec(memory_space=pltpu.MemorySpace.VMEM),   # adj    (N, N)
            pl.BlockSpec(memory_space=pltpu.MemorySpace.VMEM),   # x0     (N, H)
            pl.BlockSpec(memory_space=pltpu.MemorySpace.VMEM),   # params (L, H+2, H)
            pl.BlockSpec(memory_space=pltpu.MemorySpace.SMEM),   # gate bias (L,)
        ],
        out_specs=pl.BlockSpec(memory_space=pltpu.MemorySpace.VMEM),
    )(adj, x, params, bg)

    # (8, 128) padded tile -> (1, L, H) == torch.stack(readout, dim=1).
    return out[:L, :H][None]


def build_norm_adj(edge_index, num_nodes):
    """Dense GCN-normalized adjacency with self-loops (gcn_norm semantics)."""
    src, dst = edge_index[0], edge_index[1]
    a = jnp.zeros((num_nodes, num_nodes), jnp.float32).at[dst, src].add(1.0)
    a = a + jnp.eye(num_nodes, dtype=jnp.float32)              # add self-loops
    deg = jnp.sum(a, axis=1)                                   # in-degree (targets)
    dinv = jnp.where(deg > 0, 1.0 / jnp.sqrt(deg), 0.0)
    return dinv[:, None] * a * dinv[None, :]


def _reference_forward(adj, x, w_t, b, wg, bg):
    """Pure-JAX reference of the same forward (for correctness check)."""
    L = w_t.shape[0]
    readouts = []
    for l in range(L):
        h = jnp.maximum(adj @ (x @ w_t[l]) + b[l], 0.0)
        gate = jax.nn.sigmoid(jnp.sum(h * wg[l], axis=-1, keepdims=True) + bg[l])
        att = jax.nn.softmax(gate, axis=0)
        readouts.append(jnp.sum(att * h, axis=0))
        x = h
    return jnp.stack(readouts, axis=0)[None]                   # (1, L, H)


if __name__ == "__main__":
    num_layers = 3
    hidden = 32
    num_nodes = 16

    key = jax.random.PRNGKey(0)
    k_x, k_w, k_wg, k_bg = jax.random.split(key, 4)

    # Node features (N, H)
    x = jax.random.normal(k_x, (num_nodes, hidden), dtype=jnp.float32)

    # Deterministic bidirectional ring graph: edge_index shape (2, 2N)
    idx = jnp.arange(num_nodes)
    src = jnp.concatenate([idx, (idx + 1) % num_nodes])
    dst = jnp.concatenate([(idx + 1) % num_nodes, idx])
    edge_index = jnp.stack([src, dst], axis=0)

    adj = build_norm_adj(edge_index, num_nodes)

    # Per-layer parameters (deterministic synthetic init).
    # GCNConv weight: glorot-style, stored pre-transposed as (H_in, H_out).
    glorot = (6.0 / (hidden + hidden)) ** 0.5
    w_t = jax.random.uniform(k_w, (num_layers, hidden, hidden),
                             minval=-glorot, maxval=glorot, dtype=jnp.float32)
    b = jnp.zeros((num_layers, 1, hidden), jnp.float32)        # GCNConv bias (zeros init)
    # gate_nn Linear(hidden, 1): weight kept lane-dense as (L, 1, H), bias (L, 1, 1)
    lim = (1.0 / hidden) ** 0.5
    wg = jax.random.uniform(k_wg, (num_layers, 1, hidden),
                            minval=-lim, maxval=lim, dtype=jnp.float32)
    bg = jax.random.uniform(k_bg, (num_layers, 1, 1),
                            minval=-lim, maxval=lim, dtype=jnp.float32)
    bg_s = bg.reshape(num_layers)                              # (L,) SMEM scalars

    out = jax.block_until_ready(
        my_dynamic_gcn_pallas(adj, x, w_t, b, wg, bg_s))

    ref = _reference_forward(adj, x, w_t, b, wg, bg)
    assert out.shape == (1, num_layers, hidden), out.shape
    assert jnp.allclose(out, ref, atol=1e-4, rtol=1e-4), "mismatch vs reference"

    print("KERNEL_OK")
</pallas_src>

<mosaic_0001>
module attributes {stable_mosaic.version = 11 : i64} {
  func.func @_dyn_gcn_kernel(%arg0: memref<16x16xf32, #tpu.memory_space<vmem>>, %arg1: memref<16x32xf32, #tpu.memory_space<vmem>>, %arg2: memref<3x34x32xf32, #tpu.memory_space<vmem>>, %arg3: memref<3xf32, #tpu.memory_space<smem>>, %arg4: memref<8x128xf32, #tpu.memory_space<vmem>>) attributes {dimension_semantics = [], scalar_prefetch = 0 : i64, scratch_operands = 0 : i64, tpu.core_type = #tpu.core_type<tc>} {
    %c0 = arith.constant 0 : index
    %c0_0 = arith.constant 0 : index
    %0 = vector.load %arg0[%c0, %c0_0] : memref<16x16xf32, #tpu.memory_space<vmem>>, vector<16x16xf32>
    %c0_1 = arith.constant 0 : index
    %c0_2 = arith.constant 0 : index
    %1 = vector.load %arg1[%c0_1, %c0_2] : memref<16x32xf32, #tpu.memory_space<vmem>>, vector<16x32xf32>
    %cst = arith.constant 0.000000e+00 : f32
    %2 = vector.broadcast %cst : f32 to vector<8x128xf32>
    %c0_3 = arith.constant 0 : index
    %c0_4 = arith.constant 0 : index
    %3 = vector.load %arg4[%c0_3, %c0_4] : memref<8x128xf32, #tpu.memory_space<vmem>>, vector<8x128xf32>
    tpu.vector_store %arg4[%c0_3, %c0_4], %2 {strides = array<i32>} : memref<8x128xf32, #tpu.memory_space<vmem>>, vector<8x128xf32>,
    %c0_5 = arith.constant 0 : index
    %c0_6 = arith.constant 0 : index
    %c0_7 = arith.constant 0 : index
    %4 = vector.load %arg2[%c0_5, %c0_6, %c0_7] : memref<3x34x32xf32, #tpu.memory_space<vmem>>, vector<1x32x32xf32>
    %5 = vector.shape_cast %4 : vector<1x32x32xf32> to vector<32x32xf32>
    %c0_8 = arith.constant 0 : index
    %c32 = arith.constant 32 : index
    %c0_9 = arith.constant 0 : index
    %6 = vector.load %arg2[%c0_8, %c32, %c0_9] : memref<3x34x32xf32, #tpu.memory_space<vmem>>, vector<1x1x32xf32>
    %7 = vector.shape_cast %6 : vector<1x1x32xf32> to vector<1x32xf32>
    %c0_10 = arith.constant 0 : index
    %c33 = arith.constant 33 : index
    %c0_11 = arith.constant 0 : index
    %8 = vector.load %arg2[%c0_10, %c33, %c0_11] : memref<3x34x32xf32, #tpu.memory_space<vmem>>, vector<1x1x32xf32>
    %9 = vector.shape_cast %8 : vector<1x1x32xf32> to vector<1x32xf32>
    %cst_12 = arith.constant dense<0.000000e+00> : vector<16x32xf32>
    %10 = tpu.matmul %1, %5, %cst_12 {dimension_numbers = #tpu.dot_dimension_numbers<[1], [0], [0], [1], [0, 0, 1, 1], [], []>} : vector<16x32xf32>, vector<32x32xf32>, vector<16x32xf32> -> vector<16x32xf32>
    %cst_13 = arith.constant dense<0.000000e+00> : vector<16x32xf32>
    %11 = tpu.matmul %0, %10, %cst_13 {dimension_numbers = #tpu.dot_dimension_numbers<[1], [0], [0], [1], [0, 0, 1, 1], [], []>} : vector<16x16xf32>, vector<16x32xf32>, vector<16x32xf32> -> vector<16x32xf32>
    %12 = vector.broadcast %7 : vector<1x32xf32> to vector<16x32xf32>
    %13 = arith.addf %11, %12 : vector<16x32xf32>
    %cst_14 = arith.constant 0.000000e+00 : f32
    %14 = vector.broadcast %cst_14 : f32 to vector<16x32xf32>
    %15 = arith.maximumf %13, %14 : vector<16x32xf32>
    %16 = vector.broadcast %9 : vector<1x32xf32> to vector<16x32xf32>
    %17 = arith.mulf %15, %16 : vector<16x32xf32>
    %cst_15 = arith.constant dense<0.000000e+00> : vector<16xf32>
    %18 = vector.multi_reduction <add>, %17, %cst_15 [1] : vector<16x32xf32> to vector<16xf32>
    %19 = vector.shape_cast %18 : vector<16xf32> to vector<16x1xf32>
    %c0_16 = arith.constant 0 : index
    %20 = memref.load %arg3[%c0_16] : memref<3xf32, #tpu.memory_space<smem>>
    %21 = vector.broadcast %20 : f32 to vector<16x1xf32>
    %22 = arith.addf %19, %21 : vector<16x1xf32>
    %23 = arith.negf %22 : vector<16x1xf32>
    %24 = math.exp %23 : vector<16x1xf32>
    %cst_17 = arith.constant 1.000000e+00 : f32
    %25 = vector.broadcast %cst_17 : f32 to vector<16x1xf32>
    %26 = arith.addf %25, %24 : vector<16x1xf32>
    %27 = arith.divf %25, %26 : vector<16x1xf32>
    %28 = math.exp %27 : vector<16x1xf32>
    %cst_18 = arith.constant dense<0.000000e+00> : vector<1xf32>
    %29 = vector.multi_reduction <add>, %28, %cst_18 [0] : vector<16x1xf32> to vector<1xf32>
    %30 = vector.shape_cast %29 : vector<1xf32> to vector<1x1xf32>
    %31 = vector.broadcast %28 : vector<16x1xf32> to vector<16x32xf32>
    %32 = arith.mulf %31, %15 : vector<16x32xf32>
    %cst_19 = arith.constant dense<0.000000e+00> : vector<32xf32>
    %33 = vector.multi_reduction <add>, %32, %cst_19 [0] : vector<16x32xf32> to vector<32xf32>
    %34 = vector.shape_cast %33 : vector<32xf32> to vector<1x32xf32>
    %35 = vector.broadcast %30 : vector<1x1xf32> to vector<1x32xf32>
    %36 = arith.divf %34, %35 : vector<1x32xf32>
    %c0_20 = arith.constant 0 : index
    %c0_21 = arith.constant 0 : index
    %37 = vector.load %arg4[%c0_20, %c0_21] : memref<8x128xf32, #tpu.memory_space<vmem>>, vector<1x32xf32>
    tpu.vector_store %arg4[%c0_20, %c0_21], %36 {strides = array<i32>} : memref<8x128xf32, #tpu.memory_space<vmem>>, vector<1x32xf32>,
    %c1 = arith.constant 1 : index
    %c0_22 = arith.constant 0 : index
    %c0_23 = arith.constant 0 : index
    %38 = vector.load %arg2[%c1, %c0_22, %c0_23] : memref<3x34x32xf32, #tpu.memory_space<vmem>>, vector<1x32x32xf32>
    %39 = vector.shape_cast %38 : vector<1x32x32xf32> to vector<32x32xf32>
    %c1_24 = arith.constant 1 : index
    %c32_25 = arith.constant 32 : index
    %c0_26 = arith.constant 0 : index
    %40 = vector.load %arg2[%c1_24, %c32_25, %c0_26] : memref<3x34x32xf32, #tpu.memory_space<vmem>>, vector<1x1x32xf32>
    %41 = vector.shape_cast %40 : vector<1x1x32xf32> to vector<1x32xf32>
    %c1_27 = arith.constant 1 : index
    %c33_28 = arith.constant 33 : index
    %c0_29 = arith.constant 0 : index
    %42 = vector.load %arg2[%c1_27, %c33_28, %c0_29] : memref<3x34x32xf32, #tpu.memory_space<vmem>>, vector<1x1x32xf32>
    %43 = vector.shape_cast %42 : vector<1x1x32xf32> to vector<1x32xf32>
    %cst_30 = arith.constant dense<0.000000e+00> : vector<16x32xf32>
    %44 = tpu.matmul %15, %39, %cst_30 {dimension_numbers = #tpu.dot_dimension_numbers<[1], [0], [0], [1], [0, 0, 1, 1], [], []>} : vector<16x32xf32>, vector<32x32xf32>, vector<16x32xf32> -> vector<16x32xf32>
    %cst_31 = arith.constant dense<0.000000e+00> : vector<16x32xf32>
    %45 = tpu.matmul %0, %44, %cst_31 {dimension_numbers = #tpu.dot_dimension_numbers<[1], [0], [0], [1], [0, 0, 1, 1], [], []>} : vector<16x16xf32>, vector<16x32xf32>, vector<16x32xf32> -> vector<16x32xf32>
    %46 = vector.broadcast %41 : vector<1x32xf32> to vector<16x32xf32>
    %47 = arith.addf %45, %46 : vector<16x32xf32>
    %cst_32 = arith.constant 0.000000e+00 : f32
    %48 = vector.broadcast %cst_32 : f32 to vector<16x32xf32>
    %49 = arith.maximumf %47, %48 : vector<16x32xf32>
    %50 = vector.broadcast %43 : vector<1x32xf32> to vector<16x32xf32>
    %51 = arith.mulf %49, %50 : vector<16x32xf32>
    %cst_33 = arith.constant dense<0.000000e+00> : vector<16xf32>
    %52 = vector.multi_reduction <add>, %51, %cst_33 [1] : vector<16x32xf32> to vector<16xf32>
    %53 = vector.shape_cast %52 : vector<16xf32> to vector<16x1xf32>
    %c1_34 = arith.constant 1 : index
    %54 = memref.load %arg3[%c1_34] : memref<3xf32, #tpu.memory_space<smem>>
    %55 = vector.broadcast %54 : f32 to vector<16x1xf32>
    %56 = arith.addf %53, %55 : vector<16x1xf32>
    %57 = arith.negf %56 : vector<16x1xf32>
    %58 = math.exp %57 : vector<16x1xf32>
    %cst_35 = arith.constant 1.000000e+00 : f32
    %59 = vector.broadcast %cst_35 : f32 to vector<16x1xf32>
    %60 = arith.addf %59, %58 : vector<16x1xf32>
    %61 = arith.divf %59, %60 : vector<16x1xf32>
    %62 = math.exp %61 : vector<16x1xf32>
    %cst_36 = arith.constant dense<0.000000e+00> : vector<1xf32>
    %63 = vector.multi_reduction <add>, %62, %cst_36 [0] : vector<16x1xf32> to vector<1xf32>
    %64 = vector.shape_cast %63 : vector<1xf32> to vector<1x1xf32>
    %65 = vector.broadcast %62 : vector<16x1xf32> to vector<16x32xf32>
    %66 = arith.mulf %65, %49 : vector<16x32xf32>
    %cst_37 = arith.constant dense<0.000000e+00> : vector<32xf32>
    %67 = vector.multi_reduction <add>, %66, %cst_37 [0] : vector<16x32xf32> to vector<32xf32>
    %68 = vector.shape_cast %67 : vector<32xf32> to vector<1x32xf32>
    %69 = vector.broadcast %64 : vector<1x1xf32> to vector<1x32xf32>
    %70 = arith.divf %68, %69 : vector<1x32xf32>
    %c1_38 = arith.constant 1 : index
    %c0_39 = arith.constant 0 : index
    %71 = vector.load %arg4[%c1_38, %c0_39] : memref<8x128xf32, #tpu.memory_space<vmem>>, vector<1x32xf32>
    tpu.vector_store %arg4[%c1_38, %c0_39], %70 {strides = array<i32>} : memref<8x128xf32, #tpu.memory_space<vmem>>, vector<1x32xf32>,
    %c2 = arith.constant 2 : index
    %c0_40 = arith.constant 0 : index
    %c0_41 = arith.constant 0 : index
    %72 = vector.load %arg2[%c2, %c0_40, %c0_41] : memref<3x34x32xf32, #tpu.memory_space<vmem>>, vector<1x32x32xf32>
    %73 = vector.shape_cast %72 : vector<1x32x32xf32> to vector<32x32xf32>
    %c2_42 = arith.constant 2 : index
    %c32_43 = arith.constant 32 : index
    %c0_44 = arith.constant 0 : index
    %74 = vector.load %arg2[%c2_42, %c32_43, %c0_44] : memref<3x34x32xf32, #tpu.memory_space<vmem>>, vector<1x1x32xf32>
    %75 = vector.shape_cast %74 : vector<1x1x32xf32> to vector<1x32xf32>
    %c2_45 = arith.constant 2 : index
    %c33_46 = arith.constant 33 : index
    %c0_47 = arith.constant 0 : index
    %76 = vector.load %arg2[%c2_45, %c33_46, %c0_47] : memref<3x34x32xf32, #tpu.memory_space<vmem>>, vector<1x1x32xf32>
    %77 = vector.shape_cast %76 : vector<1x1x32xf32> to vector<1x32xf32>
    %cst_48 = arith.constant dense<0.000000e+00> : vector<16x32xf32>
    %78 = tpu.matmul %49, %73, %cst_48 {dimension_numbers = #tpu.dot_dimension_numbers<[1], [0], [0], [1], [0, 0, 1, 1], [], []>} : vector<16x32xf32>, vector<32x32xf32>, vector<16x32xf32> -> vector<16x32xf32>
    %cst_49 = arith.constant dense<0.000000e+00> : vector<16x32xf32>
    %79 = tpu.matmul %0, %78, %cst_49 {dimension_numbers = #tpu.dot_dimension_numbers<[1], [0], [0], [1], [0, 0, 1, 1], [], []>} : vector<16x16xf32>, vector<16x32xf32>, vector<16x32xf32> -> vector<16x32xf32>
    %80 = vector.broadcast %75 : vector<1x32xf32> to vector<16x32xf32>
    %81 = arith.addf %79, %80 : vector<16x32xf32>
    %cst_50 = arith.constant 0.000000e+00 : f32
    %82 = vector.broadcast %cst_50 : f32 to vector<16x32xf32>
    %83 = arith.maximumf %81, %82 : vector<16x32xf32>
    %84 = vector.broadcast %77 : vector<1x32xf32> to vector<16x32xf32>
    %85 = arith.mulf %83, %84 : vector<16x32xf32>
    %cst_51 = arith.constant dense<0.000000e+00> : vector<16xf32>
    %86 = vector.multi_reduction <add>, %85, %cst_51 [1] : vector<16x32xf32> to vector<16xf32>
    %87 = vector.shape_cast %86 : vector<16xf32> to vector<16x1xf32>
    %c2_52 = arith.constant 2 : index
    %88 = memref.load %arg3[%c2_52] : memref<3xf32, #tpu.memory_space<smem>>
    %89 = vector.broadcast %88 : f32 to vector<16x1xf32>
    %90 = arith.addf %87, %89 : vector<16x1xf32>
    %91 = arith.negf %90 : vector<16x1xf32>
    %92 = math.exp %91 : vector<16x1xf32>
    %cst_53 = arith.constant 1.000000e+00 : f32
    %93 = vector.broadcast %cst_53 : f32 to vector<16x1xf32>
    %94 = arith.addf %93, %92 : vector<16x1xf32>
    %95 = arith.divf %93, %94 : vector<16x1xf32>
    %96 = math.exp %95 : vector<16x1xf32>
    %cst_54 = arith.constant dense<0.000000e+00> : vector<1xf32>
    %97 = vector.multi_reduction <add>, %96, %cst_54 [0] : vector<16x1xf32> to vector<1xf32>
    %98 = vector.shape_cast %97 : vector<1xf32> to vector<1x1xf32>
    %99 = vector.broadcast %96 : vector<16x1xf32> to vector<16x32xf32>
    %100 = arith.mulf %99, %83 : vector<16x32xf32>
    %cst_55 = arith.constant dense<0.000000e+00> : vector<32xf32>
    %101 = vector.multi_reduction <add>, %100, %cst_55 [0] : vector<16x32xf32> to vector<32xf32>
    %102 = vector.shape_cast %101 : vector<32xf32> to vector<1x32xf32>
    %103 = vector.broadcast %98 : vector<1x1xf32> to vector<1x32xf32>
    %104 = arith.divf %102, %103 : vector<1x32xf32>
    %c2_56 = arith.constant 2 : index
    %c0_57 = arith.constant 0 : index
    %105 = vector.load %arg4[%c2_56, %c0_57] : memref<8x128xf32, #tpu.memory_space<vmem>>, vector<1x32xf32>
    tpu.vector_store %arg4[%c2_56, %c0_57], %104 {strides = array<i32>} : memref<8x128xf32, #tpu.memory_space<vmem>>, vector<1x32xf32>,
    return
  }
}

</mosaic_0001>

<bundles_post_ra>
// kernel: tpu_custom_call.1
= control target key start
LH: loop header
LB: loop body
LE: loop exit
PB: predicated region body
PF: predicated region fallthrough
CT: control target
= control target key end

     0   :  { %9 = vsyncpa [#allocation4], 0  ;;  %s801_s0 = inlined_call_operand.vmem [shape: f32[16,16], index: 0, kind: input, shape index: {}]   ;;  %s802_s1 = inlined_call_operand.vmem [shape: f32[16,32], index: 1, kind: input, shape index: {}]   ;;  %s803_s2 = inlined_call_operand.vmem [shape: f32[3,34,32], index: 2, kind: input, shape index: {}]   ;;  %s804_s3 = inlined_call_operand.vmem [shape: f32[3], index: 3, kind: input, shape index: {}]   ;;  %s805_s4 = inlined_call_operand.hbm [shape: f32[8,128], index: 4, kind: output, shape index: {}]  }
   0x1   :  { %10 = vsyncpa [#allocation3], 0  ;;  %s22_s17 = sshll.u32 %s804_s3, 4  ;;  %s641_s18 = smov [#allocation2]   ;;  %s23_s17 = int_to_ptr.vmem [resolvable:$true] %s22_s17 }
   0x2   :  { %25 = dma.vmem_to_smem %s23_s17, 16, %s641_s18, [#allocation4]  }
   0x3   :  { %637 = dma.done.wait [#allocation4], 16  }
   0x4   :  { %638 = vsyncadd [#allocation4], 4294967280 }
   0x5   :  { %30 = sfence }
   0x6   :  { %v39_v0 = vld [vmem:[%s803_s2 + $0x18] sm:$0xff]  ;;  %v38_v1 = vld [vmem:[%s803_s2 + $0x10] sm:$0xff]  ;;  %v37_v2 = vld [vmem:[%s803_s2 + $0x8] sm:$0xff]  ;;  %vm42_vm0 = vcmask 261120   ;;  %vm73_vm1 = vcmask 130048   ;;  %s114_s18 = sld [smem:[#allocation2]] }
   0x7   :  { %61 = vmatpush.msra.mxu0 %v39_v0  ;;  %v36_v3 = vld [vmem:[%s803_s2] sm:$0xff]  ;;  %v34_v5 = vld [vmem:[%s802_s1 + $0x8] sm:$0xff]  ;;  %v522_v11 = vld [vmem:[%s803_s2 + $0x38] sm:$0xff]  ;;  %vm193_vm14 = vcmask 253952   ;;  %s530_s30 = sld [smem:[#allocation2 + $0x1]]  ;;  %s504_s12 = sshll.u32 %s805_s4, 4  ;;  %s505_s12 = int_to_ptr.hbm [resolvable:$true] %s504_s12 }
   0x8   :  { %v33_v4 = vld [vmem:[%s802_s1] sm:$0xff]  ;;  %v703_v10 = vld [vmem:[%s801_s0 + $0x8] sm:$0xff]  ;;  %v521_v12 = vld [vmem:[%s803_s2 + $0x30] sm:$0xff]  ;;  %s543_s9 = sld [smem:[#allocation2 + $0x2]] }
   0x9   :  { %62 = vmatpush.msra.mxu0 %v38_v1  ;;  %v523_v6 = vld [vmem:[%s803_s2 + $0x40] sm:$0xff]  ;;  %v520_v13 = vld [vmem:[%s803_s2 + $0x28] sm:$0xff]  ;;  %v642_v1 = vmov 0.0  }
   0xa   :  { %220 = vmatpush.msra.mxu2 %v523_v6  ;;  %v698_v9 = vld [vmem:[%s801_s0] sm:$0xff]  ;;  %v536_v42 = vld [vmem:[%s803_s2 + $0x68] sm:$0xff]  ;;  %35 = vst [vmem:[#allocation5] sm:$0xff] %v642_v1 }
   0xb   :  { %63 = vmatpush.msra.mxu0 %v37_v2  ;;  %v553_v14 = vld [vmem:[%s803_s2 + $0x20] ss:$0 sm:$0xff]  ;;  %v554_v19 = vld [vmem:[%s803_s2 + $0x21] ss:$0 sm:$0xff] }
   0xc   :  { %221 = vmatpush.msra.mxu2 %v522_v11  ;;  %v115_v26 = vstv %s114_s18 }
   0xd   :  { %64 = vmatpush.msra.mxu0 %v36_v3 }
   0xe   :  { %514 = vmatmul.msk.f32.vlgmr.msra.gmra.mxu0 %vm42_vm0, %v33_v4  ;;  %222 = vmatpush.msra.mxu2 %v521_v12 }
  0x10   :  { %223 = vmatpush.msra.mxu2 %v520_v13 }
  0x16   :  { %515 = vmatmul.msk.f32.gmra.mxu0 %vm42_vm0, %v34_v5 }
  0x8b   :  { %v66_v7 = vpop.f32.mrf.mxu0 }
  0x93   :  { %v69_v8 = vpop.f32.mrf.mxu0 }
  0x94   :  { %94 = vmatpush.msrb.mxu0 %v69_v8  ;;  %546 = vmatpush.msra.mxu1 %v69_v8 }
  0x96   :  { %95 = vmatpush.msrb.mxu0 %v66_v7  ;;  %547 = vmatpush.msra.mxu1 %v66_v7 }
  0x97   :  { %516 = vmatmul.msk.f32.vlgmr.msrb.gmra.mxu0 %vm73_vm1, %v698_v9  ;;  %517 = vmatmul.msk.f32.vlgmr.msra.gmra.mxu1 %vm73_vm1, %v703_v10 }
  0x98   :  { %371 = vmatpush.msrb.mxu1 %v536_v42 }
 0x114   :  { %v97_v15 = vpop.f32.mrf.mxu0  ;;  %v100_v16 = vpop.f32.mrf.mxu1 }
 0x115   :  { %v98_v17 = vadd.f32 %v553_v14, %v97_v15  ;;  %v101_v18 = vadd.f32 %v553_v14, %v100_v16 }
 0x117   :  { %v724_v20 = vmax.f32 %v98_v17, 0.0  ;;  %v728_v21 = vmax.f32 %v101_v18, 0.0 }
 0x119   :  { %526 = vmatmul.msk.f32.vlgmr.msra.gmra.mxu2 %vm42_vm0, %v724_v20  ;;  %v106_v22 = vmul.f32 %v554_v19, %v724_v20  ;;  %v107_v24 = vmul.f32 %v554_v19, %v728_v21 }
 0x11b   :  { %v108_v23 = vsel %vm42_vm0, %v106_v22, 0.0  ;;  %v111_v25 = vsel %vm42_vm0, %v107_v24, 0.0 }
 0x11c   :  { %109 = vadd.xlane.f32.xlu0 %v108_v23 }
 0x121   :  { %527 = vmatmul.msk.f32.gmra.mxu2 %vm42_vm0, %v728_v21 }
 0x124   :  { %112 = vadd.xlane.f32.xlu0 %v111_v25 }
 0x18f   :  { %v110_v27 = vpop.xlane.xlu0 %109 }
 0x190   :  { %v116_v28 = vadd.f32 %v115_v26, %v110_v27 }
 0x192   :  { %v518_v29 = vmul.f32 -1.442695, %v116_v28 }
 0x194   :  { %559 = vpow2.f32 %v518_v29 }
 0x197   :  { %v113_v30 = vpop.xlane.xlu0 %112 }
 0x198   :  { %v117_v31 = vadd.f32 %v115_v26, %v113_v30 }
 0x19a   :  { %v560_v32 = vpop.eup %559  ;;  %v519_v33 = vmul.f32 -1.442695, %v117_v31 }
 0x19b   :  { %v124_v34 = vadd.f32 1.0, %v560_v32  ;;  %v535_v32 = vld [vmem:[%s803_s2 + $0x60] sm:$0xff] }
 0x19c   :  { %561 = vpow2.f32 %v519_v33  ;;  %v225_v35 = vpop.f32.mrf.mxu2  ;;  %372 = vmatpush.msrb.mxu1 %v535_v32  ;;  %v534_v33 = vld [vmem:[%s803_s2 + $0x58] sm:$0xff] }
 0x19d   :  { %563 = vrcp.f32 %v124_v34  ;;  %v137_v44 = vand.u32 2147483648, %v124_v34  ;;  %vm131_vm3 = vweird.f32 %v124_v34  ;;  %v135_v46 = vand.u32 2147483647, %v124_v34 }
 0x19e   :  { %373 = vmatpush.msrb.mxu1 %v534_v33 }
 0x19f   :  { %v138_v50 = vor.u32 1.1754944e-38, %v137_v44  ;;  %vm136_vm5 = vcmp.eq.f32.partialorder %v135_v46, 8.507059e+37 }
 0x1a2   :  { %v562_v36 = vpop.eup %561 }
 0x1a3   :  { %v564_v37 = vpop.eup %563  ;;  %v125_v38 = vadd.f32 1.0, %v562_v36 }
 0x1a4   :  { %v127_v39 = vmul.f32 %v564_v37, %v124_v34  ;;  %v228_v40 = vpop.f32.mrf.mxu2  ;;  %vm132_vm2 = vweird.f32 %v564_v37  ;;  %v533_v34 = vld [vmem:[%s803_s2 + $0x50] sm:$0xff] }
 0x1a5   :  { %565 = vrcp.f32 %v125_v38  ;;  %246 = vmatpush.msrb.mxu2 %v228_v40  ;;  %548 = vmatpush.msra.mxu3 %v228_v40  ;;  %vm133_vm4 = vmor %vm131_vm3, %vm132_vm2  ;;  %v152_v53 = vand.u32 2147483648, %v125_v38  ;;  %v150_v55 = vand.u32 2147483647, %v125_v38  ;;  %vm146_vm7 = vweird.f32 %v125_v38  ;;  %v556_v40 = vld [vmem:[%s803_s2 + $0x49] ss:$0 sm:$0xff] }
 0x1a6   :  { %v128_v41 = vsub.f32 1.0, %v127_v39  ;;  %374 = vmatpush.msrb.mxu1 %v533_v34 }
 0x1a7   :  { %247 = vmatpush.msrb.mxu2 %v225_v35  ;;  %549 = vmatpush.msra.mxu3 %v225_v35  ;;  %v153_v58 = vor.u32 1.1754944e-38, %v152_v53  ;;  %vm151_vm9 = vcmp.eq.f32.partialorder %v150_v55, 8.507059e+37  ;;  %v555_v35 = vld [vmem:[%s803_s2 + $0x48] ss:$0 sm:$0xff] }
 0x1a8   :  { %v129_v43 = vmul.f32 %v564_v37, %v128_v41  ;;  %528 = vmatmul.msk.f32.vlgmr.msrb.gmra.mxu2 %vm73_vm1, %v698_v9  ;;  %529 = vmatmul.msk.f32.vlgmr.msra.gmra.mxu3 %vm73_vm1, %v703_v10 }
 0x1aa   :  { %v130_v45 = vadd.f32 %v564_v37, %v129_v43 }
 0x1ab   :  { %v566_v47 = vpop.eup %565 }
 0x1ac   :  { %v134_v48 = vsel %vm133_vm4, %v564_v37, %v130_v45  ;;  %v142_v49 = vmul.f32 %v566_v47, %v125_v38  ;;  %vm147_vm6 = vweird.f32 %v566_v47 }
 0x1ad   :  { %v139_v52 = vsel %vm136_vm5, %v138_v50, %v134_v48  ;;  %vm148_vm8 = vmor %vm146_vm7, %vm147_vm6 }
 0x1ae   :  { %v143_v51 = vsub.f32 1.0, %v142_v49  ;;  %v156_v56 = vmul.f32 1.442695, %v139_v52 }
 0x1b0   :  { %v144_v54 = vmul.f32 %v566_v47, %v143_v51  ;;  %567 = vpow2.f32 %v156_v56 }
 0x1b2   :  { %v145_v57 = vadd.f32 %v566_v47, %v144_v54 }
 0x1b4   :  { %v149_v59 = vsel %vm148_vm8, %v566_v47, %v145_v57  ;;  %v267_v47 = vstv %s530_s30 }
 0x1b5   :  { %v154_v60 = vsel %vm151_vm9, %v153_v58, %v149_v59 }
 0x1b6   :  { %v158_v61 = vmul.f32 1.442695, %v154_v60  ;;  %v568_v62 = vpop.eup %567 }
 0x1b7   :  { %v167_v2 = vmul.f32 %v568_v62, %v724_v20 }
 0x1b8   :  { %569 = vpow2.f32 %v158_v61 }
 0x1b9   :  { %v169_v7 = vsel %vm42_vm0, %v167_v2, 0.0 }
 0x1be   :  { %v570_v63 = vpop.eup %569 }
 0x1bf   :  { %v160_v0 = vadd.f32 %v570_v63, %v568_v62  ;;  %v168_v3 = vmul.f32 %v570_v63, %v728_v21 }
 0x1c1   :  { %v161_v4 = vrot.slane %v160_v0, 4  ;;  %v170_v5 = vsel %vm42_vm0, %v168_v3, 0.0 }
 0x1c2   :  { %v171_v8 = vadd.f32 %v170_v5, %v169_v7 }
 0x1c3   :  { %v162_v6 = vadd.f32 %v161_v4, %v160_v0 }
 0x1c4   :  { %v172_v13 = vrot.slane %v171_v8, 4 }
 0x1c5   :  { %v163_v11 = vrot.slane %v162_v6, 2 }
 0x1c6   :  { %v173_v16 = vadd.f32 %v172_v13, %v171_v8 }
 0x1c7   :  { %v164_v12 = vadd.f32 %v163_v11, %v162_v6 }
 0x1c8   :  { %v174_v17 = vrot.slane %v173_v16, 2 }
 0x1c9   :  { %v165_v14 = vrot.slane %v164_v12, 1 }
 0x1ca   :  { %v175_v19 = vadd.f32 %v174_v17, %v173_v16 }
 0x1cb   :  { %v166_v15 = vadd.f32 %v165_v14, %v164_v12 }
 0x1cc   :  { %v176_v23 = vrot.slane %v175_v19, 1 }
 0x1cd   :  { %571 = vrcp.f32 %v166_v15  ;;  %v189_v21 = vand.u32 2147483648, %v166_v15  ;;  %v187_v25 = vand.u32 2147483647, %v166_v15  ;;  %vm183_vm11 = vweird.f32 %v166_v15 }
 0x1ce   :  { %v177_v28 = vadd.f32 %v176_v23, %v175_v19 }
 0x1cf   :  { %v190_v27 = vor.u32 1.1754944e-38, %v189_v21  ;;  %vm188_vm13 = vcmp.eq.f32.partialorder %v187_v25, 8.507059e+37 }
 0x1d3   :  { %v572_v18 = vpop.eup %571 }
 0x1d4   :  { %v179_v20 = vmul.f32 %v572_v18, %v166_v15  ;;  %vm184_vm10 = vweird.f32 %v572_v18 }
 0x1d5   :  { %vm185_vm12 = vmor %vm183_vm11, %vm184_vm10 }
 0x1d6   :  { %v180_v22 = vsub.f32 1.0, %v179_v20 }
 0x1d8   :  { %v181_v24 = vmul.f32 %v572_v18, %v180_v22 }
 0x1da   :  { %v182_v26 = vadd.f32 %v572_v18, %v181_v24 }
 0x1dc   :  { %v186_v29 = vsel %vm185_vm12, %v572_v18, %v182_v26 }
 0x1dd   :  { %v191_v30 = vsel %vm188_vm13, %v190_v27, %v186_v29 }
 0x1de   :  { %v192_v31 = vmul.f32 %v191_v30, %v177_v28 }
 0x1e0   :  { %194 = vst.msk [vmem:[#allocation5] sm:$0x1] %vm193_vm14, %v192_v31 }
 0x22b   :  { %v249_v36 = vpop.f32.mrf.mxu2  ;;  %v252_v37 = vpop.f32.mrf.mxu3 }
 0x22c   :  { %v250_v38 = vadd.f32 %v555_v35, %v249_v36  ;;  %v253_v39 = vadd.f32 %v555_v35, %v252_v37 }
 0x22e   :  { %v763_v41 = vmax.f32 %v250_v38, 0.0  ;;  %v767_v42 = vmax.f32 %v253_v39, 0.0 }
 0x230   :  { %539 = vmatmul.msk.f32.vlgmr.msrb.gmra.mxu1 %vm42_vm0, %v763_v41  ;;  %v258_v43 = vmul.f32 %v556_v40, %v763_v41  ;;  %v259_v45 = vmul.f32 %v556_v40, %v767_v42 }
 0x232   :  { %v260_v44 = vsel %vm42_vm0, %v258_v43, 0.0  ;;  %v263_v46 = vsel %vm42_vm0, %v259_v45, 0.0 }
 0x233   :  { %261 = vadd.xlane.f32.xlu1 %v260_v44 }
 0x238   :  { %540 = vmatmul.msk.f32.gmra.mxu1 %vm42_vm0, %v767_v42 }
 0x23b   :  { %264 = vadd.xlane.f32.xlu1 %v263_v46 }
 0x2a6   :  { %v262_v48 = vpop.xlane.xlu1 %261 }
 0x2a7   :  { %v268_v49 = vadd.f32 %v267_v47, %v262_v48 }
 0x2a9   :  { %v531_v50 = vmul.f32 -1.442695, %v268_v49  ;;  %v557_v49 = vld [vmem:[%s803_s2 + $0x70] ss:$0 sm:$0xff] }
 0x2ab   :  { %573 = vpow2.f32 %v531_v50 }
 0x2ad   :  { %v376_v51 = vpop.f32.mrf.mxu1 }
 0x2ae   :  { %v265_v52 = vpop.xlane.xlu1 %264 }
 0x2af   :  { %v269_v53 = vadd.f32 %v267_v47, %v265_v52  ;;  %v558_v52 = vld [vmem:[%s803_s2 + $0x71] ss:$0 sm:$0xff]  ;;  %s643_s2 = smov [#allocation5]  }
 0x2b0   :  { %s502_s1 = sshll.u32 %s643_s2, 4  ;;  %s503_s1 = int_to_ptr.vmem [resolvable:$true] %s502_s1 }
 0x2b1   :  { %v574_v54 = vpop.eup %573  ;;  %v532_v55 = vmul.f32 -1.442695, %v269_v53 }
 0x2b2   :  { %v276_v56 = vadd.f32 1.0, %v574_v54 }
 0x2b3   :  { %575 = vpow2.f32 %v532_v55 }
 0x2b4   :  { %577 = vrcp.f32 %v276_v56  ;;  %v289_v0 = vand.u32 2147483648, %v276_v56  ;;  %vm283_vm2 = vweird.f32 %v276_v56  ;;  %v287_v2 = vand.u32 2147483647, %v276_v56 }
 0x2b5   :  { %v379_v57 = vpop.f32.mrf.mxu1 }
 0x2b6   :  { %397 = vmatpush.msrb.mxu3 %v379_v57  ;;  %v290_v6 = vor.u32 1.1754944e-38, %v289_v0  ;;  %vm288_vm4 = vcmp.eq.f32.partialorder %v287_v2, 8.507059e+37 }
 0x2b8   :  { %398 = vmatpush.msrb.mxu3 %v376_v51 }
 0x2b9   :  { %v576_v58 = vpop.eup %575  ;;  %541 = vmatmul.msk.f32.vlgmr.msrb.gmra.mxu3 %vm73_vm1, %v698_v9 }
 0x2ba   :  { %v578_v59 = vpop.eup %577  ;;  %v277_v60 = vadd.f32 1.0, %v576_v58 }
 0x2bb   :  { %v279_v61 = vmul.f32 %v578_v59, %v276_v56  ;;  %vm284_vm15 = vweird.f32 %v578_v59 }
 0x2bc   :  { %579 = vrcp.f32 %v277_v60  ;;  %vm285_vm3 = vmor %vm283_vm2, %vm284_vm15  ;;  %v304_v8 = vand.u32 2147483648, %v277_v60  ;;  %v302_v12 = vand.u32 2147483647, %v277_v60  ;;  %vm298_vm6 = vweird.f32 %v277_v60 }
 0x2bd   :  { %v280_v62 = vsub.f32 1.0, %v279_v61  ;;  %v418_v61 = vstv %s543_s9 }
 0x2be   :  { %v305_v15 = vor.u32 1.1754944e-38, %v304_v8  ;;  %vm303_vm8 = vcmp.eq.f32.partialorder %v302_v12, 8.507059e+37 }
 0x2bf   :  { %v281_v63 = vmul.f32 %v578_v59, %v280_v62 }
 0x2c1   :  { %v282_v1 = vadd.f32 %v578_v59, %v281_v63  ;;  %542 = vmatmul.msk.f32.gmra.mxu3 %vm73_vm1, %v703_v10 }
 0x2c2   :  { %v580_v3 = vpop.eup %579 }
 0x2c3   :  { %v286_v4 = vsel %vm285_vm3, %v578_v59, %v282_v1  ;;  %v294_v5 = vmul.f32 %v580_v3, %v277_v60  ;;  %vm299_vm5 = vweird.f32 %v580_v3 }
 0x2c4   :  { %v291_v7 = vsel %vm288_vm4, %v290_v6, %v286_v4  ;;  %vm300_vm7 = vmor %vm298_vm6, %vm299_vm5 }
 0x2c5   :  { %v295_v9 = vsub.f32 1.0, %v294_v5  ;;  %v308_v13 = vmul.f32 1.442695, %v291_v7 }
 0x2c7   :  { %v296_v11 = vmul.f32 %v580_v3, %v295_v9  ;;  %581 = vpow2.f32 %v308_v13 }
 0x2c9   :  { %v297_v14 = vadd.f32 %v580_v3, %v296_v11 }
 0x2cb   :  { %v301_v16 = vsel %vm300_vm7, %v580_v3, %v297_v14 }
 0x2cc   :  { %v306_v10 = vsel %vm303_vm8, %v305_v15, %v301_v16 }
 0x2cd   :  { %v310_v17 = vmul.f32 1.442695, %v306_v10  ;;  %v582_v18 = vpop.eup %581 }
 0x2ce   :  { %v319_v22 = vmul.f32 %v582_v18, %v763_v41 }
 0x2cf   :  { %583 = vpow2.f32 %v310_v17 }
 0x2d0   :  { %v321_v26 = vsel %vm42_vm0, %v319_v22, 0.0 }
 0x2d5   :  { %v584_v19 = vpop.eup %583 }
 0x2d6   :  { %v312_v20 = vadd.f32 %v584_v19, %v582_v18  ;;  %v320_v21 = vmul.f32 %v584_v19, %v767_v42 }
 0x2d8   :  { %v313_v23 = vrot.slane %v312_v20, 4  ;;  %v322_v24 = vsel %vm42_vm0, %v320_v21, 0.0 }
 0x2d9   :  { %v323_v27 = vadd.f32 %v322_v24, %v321_v26 }
 0x2da   :  { %v314_v25 = vadd.f32 %v313_v23, %v312_v20 }
 0x2db   :  { %v324_v30 = vrot.slane %v323_v27, 4 }
 0x2dc   :  { %v315_v28 = vrot.slane %v314_v25, 2 }
 0x2dd   :  { %v325_v33 = vadd.f32 %v324_v30, %v323_v27 }
 0x2de   :  { %v316_v29 = vadd.f32 %v315_v28, %v314_v25 }
 0x2df   :  { %v326_v34 = vrot.slane %v325_v33, 2 }
 0x2e0   :  { %v317_v31 = vrot.slane %v316_v29, 1 }
 0x2e1   :  { %v327_v36 = vadd.f32 %v326_v34, %v325_v33 }
 0x2e2   :  { %v318_v32 = vadd.f32 %v317_v31, %v316_v29 }
 0x2e3   :  { %v328_v40 = vrot.slane %v327_v36, 1 }
 0x2e4   :  { %585 = vrcp.f32 %v318_v32  ;;  %v341_v39 = vand.u32 2147483648, %v318_v32  ;;  %v339_v42 = vand.u32 2147483647, %v318_v32  ;;  %vm335_vm9 = vweird.f32 %v318_v32 }
 0x2e5   :  { %v329_v45 = vadd.f32 %v328_v40, %v327_v36 }
 0x2e6   :  { %v342_v44 = vor.u32 1.1754944e-38, %v341_v39  ;;  %vm340_vm11 = vcmp.eq.f32.partialorder %v339_v42, 8.507059e+37 }
 0x2ea   :  { %v586_v35 = vpop.eup %585 }
 0x2eb   :  { %v331_v37 = vmul.f32 %v586_v35, %v318_v32  ;;  %vm336_vm1 = vweird.f32 %v586_v35 }
 0x2ec   :  { %vm337_vm10 = vmor %vm335_vm9, %vm336_vm1 }
 0x2ed   :  { %v332_v38 = vsub.f32 1.0, %v331_v37 }
 0x2ef   :  { %v333_v41 = vmul.f32 %v586_v35, %v332_v38 }
 0x2f1   :  { %v334_v43 = vadd.f32 %v586_v35, %v333_v41 }
 0x2f3   :  { %v338_v46 = vsel %vm337_vm10, %v586_v35, %v334_v43 }
 0x2f4   :  { %v343_v47 = vsel %vm340_vm11, %v342_v44, %v338_v46 }
 0x2f5   :  { %v344_v48 = vmul.f32 %v343_v47, %v329_v45 }
 0x2f7   :  { %345 = vst.msk [vmem:[#allocation5 + $0x1] sm:$0x1] %vm193_vm14, %v344_v48 }
 0x33c   :  { %v400_v50 = vpop.f32.mrf.mxu3 }
 0x33d   :  { %v787_v51 = vadd.f32 %v557_v49, %v400_v50 }
 0x33f   :  { %v406_v53 = vmax.f32 %v787_v51, 0.0 }
 0x341   :  { %v409_v54 = vmul.f32 %v558_v52, %v406_v53 }
 0x343   :  { %v411_v55 = vsel %vm42_vm0, %v409_v54, 0.0 }
 0x344   :  { %v403_v56 = vpop.f32.mrf.mxu3  ;;  %412 = vadd.xlane.f32.xlu2 %v411_v55 }
 0x345   :  { %v404_v57 = vadd.f32 %v557_v49, %v403_v56 }
 0x347   :  { %v407_v58 = vmax.f32 %v404_v57, 0.0 }
 0x349   :  { %v410_v59 = vmul.f32 %v558_v52, %v407_v58 }
 0x34b   :  { %v414_v60 = vsel %vm42_vm0, %v410_v59, 0.0 }
 0x34c   :  { %415 = vadd.xlane.f32.xlu2 %v414_v60 }
 0x3b7   :  { %v413_v62 = vpop.xlane.xlu2 %412 }
 0x3b8   :  { %v419_v63 = vadd.f32 %v418_v61, %v413_v62 }
 0x3ba   :  { %v544_v0 = vmul.f32 -1.442695, %v419_v63 }
 0x3bc   :  { %587 = vpow2.f32 %v544_v0 }
 0x3bf   :  { %v416_v1 = vpop.xlane.xlu2 %415 }
 0x3c0   :  { %v420_v2 = vadd.f32 %v418_v61, %v416_v1 }
 0x3c2   :  { %v588_v3 = vpop.eup %587  ;;  %v545_v4 = vmul.f32 -1.442695, %v420_v2 }
 0x3c3   :  { %v427_v5 = vadd.f32 1.0, %v588_v3 }
 0x3c4   :  { %589 = vpow2.f32 %v545_v4 }
 0x3c5   :  { %591 = vrcp.f32 %v427_v5  ;;  %v440_v13 = vand.u32 2147483648, %v427_v5  ;;  %vm434_vm13 = vweird.f32 %v427_v5  ;;  %v438_v15 = vand.u32 2147483647, %v427_v5 }
 0x3c7   :  { %v441_v18 = vor.u32 1.1754944e-38, %v440_v13  ;;  %vm439_vm2 = vcmp.eq.f32.partialorder %v438_v15, 8.507059e+37 }
 0x3ca   :  { %v590_v6 = vpop.eup %589 }
 0x3cb   :  { %v592_v9 = vpop.eup %591  ;;  %v428_v7 = vadd.f32 1.0, %v590_v6 }
 0x3cc   :  { %v430_v8 = vmul.f32 %v592_v9, %v427_v5  ;;  %vm435_vm12 = vweird.f32 %v592_v9 }
 0x3cd   :  { %593 = vrcp.f32 %v428_v7  ;;  %vm436_vm15 = vmor %vm434_vm13, %vm435_vm12  ;;  %v455_v22 = vand.u32 2147483648, %v428_v7  ;;  %v453_v23 = vand.u32 2147483647, %v428_v7  ;;  %vm449_vm4 = vweird.f32 %v428_v7 }
 0x3ce   :  { %v431_v11 = vsub.f32 1.0, %v430_v8 }
 0x3cf   :  { %v456_v26 = vor.u32 1.1754944e-38, %v455_v22  ;;  %vm454_vm6 = vcmp.eq.f32.partialorder %v453_v23, 8.507059e+37 }
 0x3d0   :  { %v432_v12 = vmul.f32 %v592_v9, %v431_v11 }
 0x3d2   :  { %v433_v14 = vadd.f32 %v592_v9, %v432_v12 }
 0x3d3   :  { %v594_v16 = vpop.eup %593 }
 0x3d4   :  { %v437_v10 = vsel %vm436_vm15, %v592_v9, %v433_v14  ;;  %v445_v17 = vmul.f32 %v594_v16, %v428_v7  ;;  %vm450_vm3 = vweird.f32 %v594_v16 }
 0x3d5   :  { %v442_v20 = vsel %vm439_vm2, %v441_v18, %v437_v10  ;;  %vm451_vm5 = vmor %vm449_vm4, %vm450_vm3 }
 0x3d6   :  { %v446_v19 = vsub.f32 1.0, %v445_v17  ;;  %v459_v24 = vmul.f32 1.442695, %v442_v20 }
 0x3d8   :  { %v447_v21 = vmul.f32 %v594_v16, %v446_v19  ;;  %595 = vpow2.f32 %v459_v24 }
 0x3da   :  { %v448_v25 = vadd.f32 %v594_v16, %v447_v21 }
 0x3dc   :  { %v452_v27 = vsel %vm451_vm5, %v594_v16, %v448_v25 }
 0x3dd   :  { %v457_v28 = vsel %vm454_vm6, %v456_v26, %v452_v27 }
 0x3de   :  { %v461_v29 = vmul.f32 1.442695, %v457_v28  ;;  %v596_v30 = vpop.eup %595 }
 0x3df   :  { %v470_v33 = vmul.f32 %v596_v30, %v406_v53 }
 0x3e0   :  { %597 = vpow2.f32 %v461_v29 }
 0x3e1   :  { %v472_v38 = vsel %vm42_vm0, %v470_v33, 0.0 }
 0x3e6   :  { %v598_v31 = vpop.eup %597 }
 0x3e7   :  { %v463_v32 = vadd.f32 %v598_v31, %v596_v30  ;;  %v471_v34 = vmul.f32 %v598_v31, %v407_v58 }
 0x3e9   :  { %v464_v35 = vrot.slane %v463_v32, 4  ;;  %v473_v36 = vsel %vm42_vm0, %v471_v34, 0.0 }
 0x3ea   :  { %v474_v39 = vadd.f32 %v473_v36, %v472_v38 }
 0x3eb   :  { %v465_v37 = vadd.f32 %v464_v35, %v463_v32 }
 0x3ec   :  { %v475_v42 = vrot.slane %v474_v39, 4 }
 0x3ed   :  { %v466_v40 = vrot.slane %v465_v37, 2 }
 0x3ee   :  { %v476_v45 = vadd.f32 %v475_v42, %v474_v39 }
 0x3ef   :  { %v467_v41 = vadd.f32 %v466_v40, %v465_v37 }
 0x3f0   :  { %v477_v46 = vrot.slane %v476_v45, 2 }
 0x3f1   :  { %v468_v43 = vrot.slane %v467_v41, 1 }
 0x3f2   :  { %v478_v48 = vadd.f32 %v477_v46, %v476_v45 }
 0x3f3   :  { %v469_v44 = vadd.f32 %v468_v43, %v467_v41 }
 0x3f4   :  { %v479_v52 = vrot.slane %v478_v48, 1 }
 0x3f5   :  { %599 = vrcp.f32 %v469_v44  ;;  %v492_v51 = vand.u32 2147483648, %v469_v44  ;;  %v490_v54 = vand.u32 2147483647, %v469_v44  ;;  %vm486_vm0 = vweird.f32 %v469_v44 }
 0x3f6   :  { %v480_v57 = vadd.f32 %v479_v52, %v478_v48 }
 0x3f7   :  { %v493_v56 = vor.u32 1.1754944e-38, %v492_v51  ;;  %vm491_vm1 = vcmp.eq.f32.partialorder %v490_v54, 8.507059e+37 }
 0x3fb   :  { %v600_v47 = vpop.eup %599 }
 0x3fc   :  { %v482_v49 = vmul.f32 %v600_v47, %v469_v44  ;;  %vm487_vm7 = vweird.f32 %v600_v47 }
 0x3fd   :  { %vm488_vm8 = vmor %vm486_vm0, %vm487_vm7 }
 0x3fe   :  { %v483_v50 = vsub.f32 1.0, %v482_v49 }
 0x400   :  { %v484_v53 = vmul.f32 %v600_v47, %v483_v50 }
 0x402   :  { %v485_v55 = vadd.f32 %v600_v47, %v484_v53 }
 0x404   :  { %v489_v58 = vsel %vm488_vm8, %v600_v47, %v485_v55 }
 0x405   :  { %v494_v59 = vsel %vm491_vm1, %v493_v56, %v489_v58 }
 0x406   :  { %v495_v60 = vmul.f32 %v494_v59, %v480_v57 }
 0x408   :  { %496 = vst.msk [vmem:[#allocation5 + $0x2] sm:$0x1] %vm193_vm14, %v495_v60 }
 0x409   :  { %507 = dma.vmem_to_hbm [thread:$0]  %s503_s1, 128, %s505_s12, [#allocation3]  }
 0x40a   :  { %639 = dma.done.wait [#allocation3], 128  }
 0x40b   :  { %640 = vsyncadd [#allocation3], 4294967168 }
 0x40c   :  { %512 = vsyncpa [#allocation3], 1 }
 0x40d   :  { %513 = vsyncpa [#allocation4], 1 }

</bundles_post_ra>
